<compile_context>
chip_gen: v6e
topology: v6e:2x2x1
jax: 0.10.0
libtpu: 0.0.40
codegen_flags: <defaults>
</compile_context>

<pallas_src>
import functools

import jax
import jax.numpy as jnp
from jax.experimental import pallas as pl
from jax.experimental.pallas import tpu as pltpu


def _round_up(x, m):
    return ((x + m - 1) // m) * m


def _choose_tk(rows_for_sizing, k_true, itemsize, target_bytes=2 << 20):
    """Adaptive K tile: ~2 MiB per input block, multiple of 512, never larger
    than the 128-padded K (so tiny-K shapes stay a single exact block)."""
    k_ceil = _round_up(k_true, 128)
    tk = max(512, _round_up(target_bytes // max(rows_for_sizing * itemsize, 1), 512))
    return min(tk, k_ceil)


def _vmem_limit_bytes(needed_bytes):
    """Generation-aware VMEM limit: ~75% of physical capacity (≈48 MiB on a
    v7x TensorCore, ≈96 MiB on v5e/v6e). Falls back to the smallest (v7x)
    assumption if the hardware query is unavailable."""
    cap = 64 << 20
    try:
        info = pltpu.get_tpu_info()
        cap = int(getattr(info, "vmem_capacity_bytes", cap)) or cap
    except Exception:
        pass
    ceiling = (cap * 3) // 4
    return int(min(max(needed_bytes, 16 << 20), ceiling))


# ----------------------------------------------------------------------------
# Path A: single K-reduction axis, full-M blocks (typical style-transfer M).
# ----------------------------------------------------------------------------
def _style_loss_kernel(fin_ref, ftg_ref, loss_ref, gdiff_acc, *,
                       tk, k_true, needs_mask, inv_norm, inv_elems):
    """Grid axis 0 iterates tiles of the K = h*w dimension.

    fin_ref / ftg_ref : (M, tk) tiles of the input / target feature matrices.
    loss_ref          : (1, 1) SMEM scalar output (MSE between Gram matrices).
    gdiff_acc         : (M, M) f32 VMEM accumulator of (F_in F_in^T - F_tg F_tg^T).
    """
    k = pl.program_id(0)

    @pl.when(k == 0)
    def _():
        gdiff_acc[...] = jnp.zeros_like(gdiff_acc)

    def load(ref):
        x = ref[...]
        if needs_mask:
            # Zero the out-of-bounds tail columns of the last K tile (Pallas
            # leaves OOB block regions unspecified).
            col = jax.lax.broadcasted_iota(jnp.int32, x.shape, 1)
            x = jnp.where(k * tk + col < k_true, x, jnp.zeros_like(x))
        return x

    xin = load(fin_ref)
    xtg = load(ftg_ref)
    # Contract on the last dim of BOTH operands: F @ F.T with no transpose.
    dn = (((1,), (1,)), ((), ()))
    g_in = jax.lax.dot_general(xin, xin, dn, preferred_element_type=jnp.float32)
    g_tg = jax.lax.dot_general(xtg, xtg, dn, preferred_element_type=jnp.float32)
    gdiff_acc[...] += g_in - g_tg

    @pl.when(k == pl.num_programs(0) - 1)
    def _():
        d = gdiff_acc[...]
        loss_ref[0, 0] = jnp.sum(d * d) * (inv_norm * inv_norm * inv_elems)


def _style_loss_single(f_in, f_tg, M, K, itemsize, inv_norm, inv_elems):
    tk = _choose_tk(max(M, 8), K, itemsize)
    grid_k = pl.cdiv(K, tk)
    needs_mask = (K % tk) != 0

    kernel = functools.partial(_style_loss_kernel, tk=tk, k_true=K,
                               needs_mask=needs_mask,
                               inv_norm=inv_norm, inv_elems=inv_elems)

    # 2 inputs x 2 pipeline buffers x (M, tk) blocks + (M, M) f32 accumulator
    # + headroom for compiler-internal scratch.
    block_bytes = M * tk * itemsize
    vmem_bytes = _vmem_limit_bytes(2 * 2 * block_bytes + M * M * 4 + (4 << 20))

    # TODO(synk): if profiling on v7x still shows exposed DMA, add
    # pipeline_mode=pl.Buffered(3) to the two input BlockSpecs.
    loss = pl.pallas_call(
        kernel,
        out_shape=jax.ShapeDtypeStruct((1, 1), jnp.float32),
        grid_spec=pltpu.PrefetchScalarGridSpec(
            num_scalar_prefetch=0,
            grid=(grid_k,),
            in_specs=[
                pl.BlockSpec((M, tk), lambda k: (0, k)),
                pl.BlockSpec((M, tk), lambda k: (0, k)),
            ],
            out_specs=pl.BlockSpec(memory_space=pltpu.MemorySpace.SMEM),
            scratch_shapes=[pltpu.VMEM((M, M), jnp.float32)],
        ),
        compiler_params=pltpu.CompilerParams(
            dimension_semantics=("arbitrary",),
            vmem_limit_bytes=vmem_bytes),
    )(f_in, f_tg)
    return loss[0, 0]


# ----------------------------------------------------------------------------
# Path B: M-row-blocked grid for large M (bounds the accumulator; the
# "parallel" row axis lets v7x shard row blocks across its 2 TensorCores).
# ----------------------------------------------------------------------------
def _style_loss_kernel_mblocked(lin_ref, ltg_ref, rin_ref, rtg_ref, out_ref,
                                gdiff_acc, *, tk, k_true, needs_mask,
                                inv_norm, inv_elems):
    """Grid = (M//tm row blocks, K tiles).

    lin/ltg : (tm, tk) row-block tiles of input / target features.
    rin/rtg : (M, tk) all-rows tiles of input / target features.
    out_ref : (1, 8, 128) per-row-block tile; partial loss broadcast into it.
    gdiff_acc : (tm, M) f32 accumulator of this row block of the Gram diff.
    """
    k = pl.program_id(1)

    @pl.when(k == 0)
    def _():
        gdiff_acc[...] = jnp.zeros_like(gdiff_acc)

    def load(ref):
        x = ref[...]
        if needs_mask:
            col = jax.lax.broadcasted_iota(jnp.int32, x.shape, 1)
            x = jnp.where(k * tk + col < k_true, x, jnp.zeros_like(x))
        return x

    dn = (((1,), (1,)), ((), ()))
    g_in = jax.lax.dot_general(load(lin_ref), load(rin_ref), dn,
                               preferred_element_type=jnp.float32)
    g_tg = jax.lax.dot_general(load(ltg_ref), load(rtg_ref), dn,
                               preferred_element_type=jnp.float32)
    gdiff_acc[...] += g_in - g_tg

    @pl.when(k == pl.num_programs(1) - 1)
    def _():
        d = gdiff_acc[...]
        partial = jnp.sum(d * d) * (inv_norm * inv_norm * inv_elems)
        out_ref[...] = jnp.broadcast_to(partial, out_ref.shape)


def _style_loss_mblocked(f_in, f_tg, M, K, tm, itemsize, inv_norm, inv_elems):
    tk = _choose_tk(tm + M, K, itemsize)
    grid_m = M // tm
    grid_k = pl.cdiv(K, tk)
    needs_mask = (K % tk) != 0

    kernel = functools.partial(_style_loss_kernel_mblocked, tk=tk, k_true=K,
                               needs_mask=needs_mask,
                               inv_norm=inv_norm, inv_elems=inv_elems)

    block_bytes = (tm + M) * tk * itemsize
    vmem_bytes = _vmem_limit_bytes(2 * 2 * block_bytes + tm * M * 4 + (4 << 20))

    partial = pl.pallas_call(
        kernel,
        out_shape=jax.ShapeDtypeStruct((grid_m, 8, 128), jnp.float32),
        grid_spec=pltpu.PrefetchScalarGridSpec(
            num_scalar_prefetch=0,
            grid=(grid_m, grid_k),
            in_specs=[
                pl.BlockSpec((tm, tk), lambda i, k: (i, k)),  # input row block
                pl.BlockSpec((tm, tk), lambda i, k: (i, k)),  # target row block
                pl.BlockSpec((M, tk), lambda i, k: (0, k)),   # input, all rows
                pl.BlockSpec((M, tk), lambda i, k: (0, k)),   # target, all rows
            ],
            out_specs=pl.BlockSpec((1, 8, 128), lambda i, k: (i, 0, 0)),
            scratch_shapes=[pltpu.VMEM((tm, M), jnp.float32)],
        ),
        compiler_params=pltpu.CompilerParams(
            dimension_semantics=("parallel", "arbitrary"),
            vmem_limit_bytes=vmem_bytes),
    )(f_in, f_tg, f_in, f_tg)
    # Each row block wrote its partial loss into its (8, 128) tile.
    return jnp.sum(partial[:, 0, 0])


# ----------------------------------------------------------------------------
# Wrapper matching PyTorch StyleLoss.forward semantics.
# ----------------------------------------------------------------------------
def style_loss_forward(x, target, *, compute_dtype=jnp.float32, force_tm=None):
    """Returns (input_passthrough, loss). `compute_dtype=jnp.bfloat16` trades
    ~8 mantissa bits for native MXU rate and half the DMA bytes."""
    b, d, h, w = x.shape
    assert target.shape == x.shape, "target must match input shape"
    M = b * d
    K = h * w

    f_in = jnp.reshape(x, (M, K)).astype(compute_dtype)
    f_tg = jnp.reshape(target, (M, K)).astype(compute_dtype)
    itemsize = jnp.dtype(compute_dtype).itemsize

    inv_norm = 1.0 / float(b * d * h * w)
    inv_elems = 1.0 / float(M * M)

    # Tile the Gram-row (M) axis only when M is large enough that the (M, M)
    # accumulator would eat VMEM / the second v7x TensorCore would be idle.
    tm = force_tm
    if tm is None and M >= 2048:
        for cand in (512, 256, 128):
            if M % cand == 0:
                tm = cand
                break
    if tm is not None and (tm <= 0 or tm >= M or M % tm != 0 or tm % 8 != 0):
        tm = None  # fall back to the single-row-block path

    if tm is None:
        loss = _style_loss_single(f_in, f_tg, M, K, itemsize, inv_norm, inv_elems)
    else:
        loss = _style_loss_mblocked(f_in, f_tg, M, K, tm, itemsize,
                                    inv_norm, inv_elems)

    # StyleLoss.forward returns the input unchanged; loss is a side output.
    return x, loss


def _reference_loss(x, target):
    b, d, h, w = x.shape
    fi = jnp.reshape(x, (b * d, h * w)).astype(jnp.float32)
    ft = jnp.reshape(target, (b * d, h * w)).astype(jnp.float32)
    gi = (fi @ fi.T) / (b * d * h * w)
    gt = (ft @ ft.T) / (b * d * h * w)
    return jnp.mean((gi - gt) ** 2)


if __name__ == "__main__":
    key = jax.random.PRNGKey(0)
    k1, k2 = jax.random.split(key)

    # 1) Base shape, f32 path (single row block, adaptive K tile).
    b, d, h, w = 2, 4, 16, 16
    x = jax.random.normal(k1, (b, d, h, w), dtype=jnp.float32)
    target = jax.random.normal(k2, (b, d, h, w), dtype=jnp.float32)
    out, loss = style_loss_forward(x, target)
    out = jax.block_until_ready(out)
    loss = jax.block_until_ready(loss)
    ref = _reference_loss(x, target)
    assert jnp.allclose(out, x), "forward must return input unchanged"
    assert jnp.allclose(loss, ref, rtol=1e-5, atol=1e-6), (loss, ref)

    # 2) K not a lane multiple -> in-kernel tail masking (no jnp.pad HBM copy).
    x2 = jax.random.normal(k1, (1, 8, 10, 10), dtype=jnp.float32)
    t2 = jax.random.normal(k2, (1, 8, 10, 10), dtype=jnp.float32)
    _, loss2 = style_loss_forward(x2, t2)
    loss2 = jax.block_until_ready(loss2)
    ref2 = _reference_loss(x2, t2)
    assert jnp.allclose(loss2, ref2, rtol=1e-5, atol=1e-6), (loss2, ref2)

    # 3) bf16 feature tiles; compare against a reference on bf16-cast features.
    _, loss3 = style_loss_forward(x, target, compute_dtype=jnp.bfloat16)
    loss3 = jax.block_until_ready(loss3)
    ref3 = _reference_loss(x.astype(jnp.bfloat16), target.astype(jnp.bfloat16))
    assert jnp.allclose(loss3, ref3, rtol=1e-3, atol=1e-7), (loss3, ref3)

    # 4) M-row-blocked ("parallel" row axis) path, forced at a small shape.
    x4 = jax.random.normal(k1, (2, 128, 16, 16), dtype=jnp.float32)
    t4 = jax.random.normal(k2, (2, 128, 16, 16), dtype=jnp.float32)
    _, loss4 = style_loss_forward(x4, t4, force_tm=128)
    loss4 = jax.block_until_ready(loss4)
    ref4 = _reference_loss(x4, t4)
    assert jnp.allclose(loss4, ref4, rtol=1e-2, atol=1e-9), (loss4, ref4)

    print("KERNEL_OK")
</pallas_src>

<mosaic_0001>
module attributes {stable_mosaic.version = 11 : i64} {
  func.func @_style_loss_kernel(%arg0: i32, %arg1: memref<8x256xf32, #tpu.memory_space<vmem>>, %arg2: memref<8x256xf32, #tpu.memory_space<vmem>>, %arg3: memref<1x1xf32, #tpu.memory_space<smem>>, %arg4: memref<8x8xf32, #tpu.memory_space<vmem>>) attributes {dimension_semantics = [#tpu.dimension_semantics<arbitrary>], iteration_bounds = array<i64: 1>, scalar_prefetch = 0 : i64, scratch_operands = 1 : i64, tpu.core_type = #tpu.core_type<tc>, window_params = [{transform_indices = @transform_0, window_bounds = array<i64: 8, 256>}, {transform_indices = @transform_1, window_bounds = array<i64: 8, 256>}, {transform_indices = @transform_2, window_bounds = array<i64: 1, 1>}]} {
    %c0_i32 = arith.constant 0 : i32
    %0 = arith.cmpi eq, %arg0, %c0_i32 : i32
    %1 = arith.extui %0 : i1 to i32
    %c0_i32_0 = arith.constant 0 : i32
    %2 = arith.cmpi ne, %1, %c0_i32_0 : i32
    scf.if %2 {
      %cst_11 = arith.constant 0.000000e+00 : f32
      %14 = vector.broadcast %cst_11 : f32 to vector<8x8xf32>
      %c0_12 = arith.constant 0 : index
      %c0_13 = arith.constant 0 : index
      %15 = vector.load %arg4[%c0_12, %c0_13] : memref<8x8xf32, #tpu.memory_space<vmem>>, vector<8x8xf32>
      tpu.vector_store %arg4[%c0_12, %c0_13], %14 {strides = array<i32>} : memref<8x8xf32, #tpu.memory_space<vmem>>, vector<8x8xf32>,
    } else {
    }
    %c0 = arith.constant 0 : index
    %c0_1 = arith.constant 0 : index
    %3 = vector.load %arg1[%c0, %c0_1] : memref<8x256xf32, #tpu.memory_space<vmem>>, vector<8x256xf32>
    %c0_2 = arith.constant 0 : index
    %c0_3 = arith.constant 0 : index
    %4 = vector.load %arg2[%c0_2, %c0_3] : memref<8x256xf32, #tpu.memory_space<vmem>>, vector<8x256xf32>
    %cst = arith.constant dense<0.000000e+00> : vector<8x8xf32>
    %5 = tpu.matmul %3, %3, %cst {dimension_numbers = #tpu.dot_dimension_numbers<[1], [1], [0], [0], [0, 0, 1, 0], [], []>} : vector<8x256xf32>, vector<8x256xf32>, vector<8x8xf32> -> vector<8x8xf32>
    %cst_4 = arith.constant dense<0.000000e+00> : vector<8x8xf32>
    %6 = tpu.matmul %4, %4, %cst_4 {dimension_numbers = #tpu.dot_dimension_numbers<[1], [1], [0], [0], [0, 0, 1, 0], [], []>} : vector<8x256xf32>, vector<8x256xf32>, vector<8x8xf32> -> vector<8x8xf32>
    %c0_5 = arith.constant 0 : index
    %c0_6 = arith.constant 0 : index
    %7 = vector.load %arg4[%c0_5, %c0_6] : memref<8x8xf32, #tpu.memory_space<vmem>>, vector<8x8xf32>
    %8 = arith.subf %5, %6 : vector<8x8xf32>
    %9 = arith.addf %7, %8 : vector<8x8xf32>
    %c0_7 = arith.constant 0 : index
    %c0_8 = arith.constant 0 : index
    %10 = vector.load %arg4[%c0_7, %c0_8] : memref<8x8xf32, #tpu.memory_space<vmem>>, vector<8x8xf32>
    tpu.vector_store %arg4[%c0_7, %c0_8], %9 {strides = array<i32>} : memref<8x8xf32, #tpu.memory_space<vmem>>, vector<8x8xf32>,
    %c0_i32_9 = arith.constant 0 : i32
    %11 = arith.cmpi eq, %arg0, %c0_i32_9 : i32
    %12 = arith.extui %11 : i1 to i32
    %c0_i32_10 = arith.constant 0 : i32
    %13 = arith.cmpi ne, %12, %c0_i32_10 : i32
    scf.if %13 {
      %c0_11 = arith.constant 0 : index
      %c0_12 = arith.constant 0 : index
      %14 = vector.load %arg4[%c0_11, %c0_12] : memref<8x8xf32, #tpu.memory_space<vmem>>, vector<8x8xf32>
      %15 = arith.mulf %14, %14 : vector<8x8xf32>
      %16 = vector.shape_cast %15 : vector<8x8xf32> to vector<1x8x8xf32>
      %cst_13 = arith.constant dense<0.000000e+00> : vector<1xf32>
      %17 = vector.multi_reduction <add>, %16, %cst_13 [1, 2] : vector<1x8x8xf32> to vector<1xf32>
      %18 = vector.shape_cast %17 : vector<1xf32> to vector<1x1x1xf32>
      %19 = vector.extract %18[0, 0, 0] : f32 from vector<1x1x1xf32>
      %cst_14 = arith.constant 3.7252903E-9 : f32
      %20 = arith.mulf %19, %cst_14 : f32
      %c0_15 = arith.constant 0 : index
      %c0_16 = arith.constant 0 : index
      %21 = memref.load %arg3[%c0_15, %c0_16] : memref<1x1xf32, #tpu.memory_space<smem>>
      memref.store %20, %arg3[%c0_15, %c0_16] : memref<1x1xf32, #tpu.memory_space<smem>>
    } else {
    }
    return
  }
  func.func @transform_0(%arg0: i32) -> (i32, i32) {
    %c0_i32 = arith.constant 0 : i32
    %c0_i32_0 = arith.constant 0 : i32
    return %c0_i32, %arg0 : i32, i32
  }
  func.func @transform_1(%arg0: i32) -> (i32, i32) {
    %c0_i32 = arith.constant 0 : i32
    %c0_i32_0 = arith.constant 0 : i32
    return %c0_i32, %arg0 : i32, i32
  }
  func.func @transform_2(%arg0: i32) -> (i32, i32) {
    %c0_i32 = arith.constant 0 : i32
    %c0_i32_0 = arith.constant 0 : i32
    %c0_i32_1 = arith.constant 0 : i32
    return %c0_i32, %c0_i32_0 : i32, i32
  }
}

</mosaic_0001>

<bundles_post_ra>
// kernel: tpu_custom_call.1
= control target key start
LH: loop header
LB: loop body
LE: loop exit
PB: predicated region body
PF: predicated region fallthrough
CT: control target
= control target key end

     0   :  { %7 = vsyncpa [#allocation4], 0  ;;  %s312_s0 = inlined_call_operand.hbm [shape: f32[8,256], index: 0, kind: input, shape index: {}]   ;;  %s313_s1 = inlined_call_operand.hbm [shape: f32[8,256], index: 1, kind: input, shape index: {}]   ;;  %s314_s2 = inlined_call_operand.hbm [shape: f32[1,1], index: 2, kind: output, shape index: {}]  }
   0x1   :  { %8 = vsyncpa [#allocation7], 0 }
   0x2   :  { %9 = vsyncpa [#allocation5], 0  ;;  %s284_s9 = smov [#allocation3]   ;;  %s285_s11 = smov [#allocation6]  }
   0x3   :  { %s16_s10 = sshll.u32 %s284_s9, 4  ;;  %s26_s12 = sshll.u32 %s285_s11, 4  ;;  %s17_s10 = int_to_ptr.vmem [resolvable:$true] %s16_s10  ;;  %s27_s12 = int_to_ptr.vmem [resolvable:$true] %s26_s12 }
   0x4   :  { %s238_s13 = scalar_lea.vmem %s17_s10, 256  ;;  %p243_p1 = scmp.lt.s32.totalorder %s17_s10, %s17_s10 }
   0x5   :  { %p239_p0 = scmp.ne.s32.totalorder %s17_s10, %s238_s13  ;;  %p244_p2 = scmp.lt.s32.totalorder %s238_s13, %s238_s13 }
   0x7   :  { %p245_p3 = por %p244_p2, %p243_p1 }
   0x9   :  { %p246_p4 = pnand %p245_p3, %p239_p0 }
   0xb   :  { %249 = shalt.err (!%p246_p4)
}
   0xc   :  { %19 = dma.hbm_to_vmem [thread:$0]  %s312_s0, 256, %s17_s10, [#allocation4]  }
   0xd   :  { %s258_s16 = scalar_lea.vmem %s27_s12, 256  ;;  %p263_p6 = scmp.lt.s32.totalorder %s27_s12, %s27_s12 }
   0xe   :  { %p259_p5 = scmp.ne.s32.totalorder %s27_s12, %s258_s16  ;;  %p264_p7 = scmp.lt.s32.totalorder %s258_s16, %s258_s16 }
  0x10   :  { %p265_p8 = por %p264_p7, %p263_p6 }
  0x12   :  { %p266_p9 = pnand %p265_p8, %p259_p5 }
  0x14   :  { %269 = shalt.err (!%p266_p9)
}
  0x15   :  { %29 = dma.hbm_to_vmem [thread:$0]  %s313_s1, 256, %s27_s12, [#allocation7]  }
  0x16   :  { %278 = dma.done.wait [#allocation4], 256  }
  0x17   :  { %279 = vsyncadd [#allocation4], 4294967040 }
  0x18   :  { %280 = dma.done.wait [#allocation7], 256  }
  0x19   :  { %281 = vsyncadd [#allocation7], 4294967040  ;;  %v43_v0 = vld [vmem:[#allocation3 + $0x8] sm:$0xff]  ;;  %v45_v1 = vld [vmem:[#allocation6 + $0x8] sm:$0xff]  ;;  %vm40_vm0 = vcmask 64512   ;;  %v286_v4 = vmov 0.0  }
  0x1a   :  { %v42_v2 = vld [vmem:[#allocation3] sm:$0xff]  ;;  %76 = vmatprep.subr.mxu0 %v43_v0  ;;  %146 = vmatprep.subr.mxu1 %v45_v1  ;;  %v44_v3 = vld [vmem:[#allocation6] sm:$0xff]  ;;  %41 = vst.msk [vmem:[#allocation2] sm:$0xff] %vm40_vm0, %v286_v4  ;;  %s287_s19 = smov [#allocation8]  }
  0x1b   :  { %77 = vmatpush1.xpose.msra.mxu0 %v42_v2  ;;  %147 = vmatpush1.xpose.msra.mxu1 %v44_v3 }
  0x1c   :  { %110 = vmatprep.mubr.f32.mxu0 %v43_v0  ;;  %180 = vmatprep.mubr.f32.mxu1 %v45_v1 }
  0x1e   :  { %111 = vmatmul.mubr.f32.vlgmr.msra.gmra.mxu0 %v42_v2  ;;  %181 = vmatmul.mubr.f32.vlgmr.msra.gmra.mxu1 %v44_v3 }
  0x21   :  { %v186_v7 = vld [vmem:[#allocation2] sm:$0xff] }
  0xde   :  { %v112_v5 = vpop.f32.mrf.mxu0  ;;  %v182_v6 = vpop.f32.mrf.mxu1 }
  0xdf   :  { %v187_v8 = vsub.f32 %v112_v5, %v182_v6 }
  0xe0   :  { %v114_v9 = vpop.f32.mrf.mxu0  ;;  %v184_v10 = vpop.f32.mrf.mxu1 }
  0xe1   :  { %v188_v11 = vadd.f32 %v187_v8, %v186_v7 }
  0xe3   :  { %190 = vst.msk [vmem:[#allocation2] sm:$0xff] %vm40_vm0, %v188_v11 }
  0xea   :  { %v194_v12 = vld [vmem:[#allocation2] sm:$0xff] }
  0xeb   :  { %v195_v13 = vmul.f32 %v194_v12, %v194_v12 }
  0xed   :  { %v196_v14 = vsel %vm40_vm0, %v195_v13, 0.0 }
  0xee   :  { %197 = vadd.xlane.f32.xlu0 %v196_v14 }
 0x177   :  { %v198_v15 = vpop.xlane.xlu0 %197 }
 0x178   :  { %v199_v16 = vrot.slane %v198_v15, 4 }
 0x17a   :  { %v200_v17 = vadd.f32 %v199_v16, %v198_v15 }
 0x17c   :  { %v201_v18 = vrot.slane %v200_v17, 2 }
 0x17e   :  { %v202_v19 = vadd.f32 %v201_v18, %v200_v17 }
 0x180   :  { %v203_v20 = vrot.slane %v202_v19, 1 }
 0x182   :  { %v204_v21 = vadd.f32 %v203_v20, %v202_v19 }
 0x184   :  { %224 = vpush %v204_v21 }
 0x1b5   :  { %s225_s0 = spop %224 }
 0x1b6   :  { %s206_s1 = smul.f32 3.7252903e-09, %s225_s0 }
 0x1b8   :  { %208 = sst [smem:[#allocation8]] %s206_s1 }
 0x1b9   :  { %216 = dma.smem_to_hbm %s287_s19, 16, %s314_s2, [#allocation5]  }
 0x1ba   :  { %282 = dma.done.wait [#allocation5], 16  }
 0x1bb   :  { %283 = vsyncadd [#allocation5], 4294967280 }
 0x1bc   :  { %220 = sfence }
 0x1bd   :  { %221 = vsyncpa [#allocation4], 1 }
 0x1be   :  { %222 = vsyncpa [#allocation7], 1 }
 0x1bf   :  { %223 = vsyncpa [#allocation5], 1 }

</bundles_post_ra>
